<compile_context>
chip_gen: v5e
topology: v5e:2x2
jax: 0.10.0
libtpu: 0.0.40
codegen_flags: <defaults>
</compile_context>

<pallas_src>
import functools

import jax
import jax.numpy as jnp
from jax.experimental import pallas as pl
from jax.experimental.pallas import tpu as pltpu


def _qens_kernel(num_heads, x_ref, w1_ref, w2_ref, w3_ref,
                 b1_ref, b2_ref, b3_ref, out_ref):
    x = x_ref[...]                                    # (BT, D) bf16, shared by all heads
    cols = []
    for i in range(num_heads):                        # static unroll over heads
        h1 = jnp.dot(x, w1_ref[i], preferred_element_type=jnp.float32)      # (BT, H1) f32
        h1 = jnp.maximum(h1 + b1_ref[i], 0.0)                               # ReLU
        h2 = jnp.dot(h1.astype(jnp.bfloat16), w2_ref[i],
                     preferred_element_type=jnp.float32)                    # (BT, H2) f32
        h2 = jnp.maximum(h2 + b2_ref[i], 0.0)                               # ReLU
        # Final layer has one output: VPU multiply + lane reduce (XLU) instead of
        # an N=1 MXU matmul against a lane-padded (H2, 1) tile.
        q = jnp.sum(h2 * w3_ref[i].astype(jnp.float32), axis=-1, keepdims=True)
        cols.append(q + b3_ref[i])                                          # (BT, 1)
    out_ref[...] = jnp.concatenate(cols, axis=1).astype(out_ref.dtype)      # (BT, H)


def _pick_batch_tile(batch):
    """Tile large batches so activations never blow up VMEM; small B -> one tile."""
    for bt in (1024, 512, 256, 128):
        if batch % bt == 0:
            return bt
    return batch


def prepare_params(params):
    """One-time cast of the big matrices to bf16 (done outside the hot path so the
    per-call HBM traffic on the dominant weight stream is halved). Biases stay f32."""
    return {
        "w1": params["w1"].astype(jnp.bfloat16),
        "w2": params["w2"].astype(jnp.bfloat16),
        "w3": params["w3"].astype(jnp.bfloat16),
        "b1": params["b1"].astype(jnp.float32),
        "b2": params["b2"].astype(jnp.float32),
        "b3": params["b3"].astype(jnp.float32),
    }


@jax.jit
def q_ensemble_forward(x, a, params):
    """x: (B, obs_dim), a: (B, act_dim). params: prepare_params() output (stacked heads)."""
    inp = jnp.concatenate((x, a), axis=1).astype(jnp.bfloat16)         # (B, D)
    w1, b1, w2, b2, w3, b3 = (params[k] for k in ("w1", "b1", "w2", "b2", "w3", "b3"))
    num_heads, D, H1 = w1.shape
    H2 = w2.shape[-1]
    B = inp.shape[0]

    BT = _pick_batch_tile(B)
    num_btiles = B // BT

    # TODO(synk): for very large ensembles whose stacked weights exceed ~32 MiB of
    # VMEM, add a head-group grid axis; typical QEnsemble sizes fit comfortably.
    weight_bytes = 2 * num_heads * (D * H1 + H1 * H2 + H2)             # bf16
    bias_bytes = 4 * (b1.size + b2.size + b3.size)
    vmem_need = (2 * weight_bytes + 2 * bias_bytes                     # double-buffered
                 + 2 * 2 * BT * D + 2 * 4 * BT * num_heads             # in/out tiles
                 + 8 * BT * (H1 + H2))                                 # f32 activations
    vmem_limit = int(min(64 << 20, max(32 << 20, 2 * vmem_need)))

    grid_spec = pltpu.PrefetchScalarGridSpec(
        num_scalar_prefetch=0,
        grid=(num_btiles,),
        in_specs=[
            pl.BlockSpec((BT, D), lambda b: (b, 0)),                   # shared input tile
            # Weights / biases: whole arrays with constant index_map -> DMA'd once,
            # then VMEM-resident for every batch tile.
            pl.BlockSpec((num_heads, D, H1), lambda b: (0, 0, 0)),     # W1 (bf16)
            pl.BlockSpec((num_heads, H1, H2), lambda b: (0, 0, 0)),    # W2 (bf16)
            pl.BlockSpec((num_heads, 1, H2), lambda b: (0, 0, 0)),     # W3 rows (bf16)
            pl.BlockSpec((num_heads, 1, H1), lambda b: (0, 0, 0)),     # b1 (f32)
            pl.BlockSpec((num_heads, 1, H2), lambda b: (0, 0, 0)),     # b2 (f32)
            pl.BlockSpec((num_heads, 1, 1), lambda b: (0, 0, 0)),      # b3 (f32)
        ],
        # Full-width (BT, num_heads) output block: last dim equals the array dim,
        # so the store is always layout-legal.
        out_specs=pl.BlockSpec((BT, num_heads), lambda b: (b, 0)),
    )

    flops = 2 * B * num_heads * (D * H1 + H1 * H2 + H2)
    bytes_accessed = (weight_bytes + bias_bytes        # weights/biases read once
                      + 2 * B * D                      # bf16 input
                      + 4 * B * num_heads)             # f32 output

    return pl.pallas_call(
        functools.partial(_qens_kernel, num_heads),
        out_shape=jax.ShapeDtypeStruct((B, num_heads), jnp.float32),
        grid_spec=grid_spec,
        compiler_params=pltpu.CompilerParams(
            dimension_semantics=("parallel",),          # batch tiles fully independent
            vmem_limit_bytes=vmem_limit,
        ),
        cost_estimate=pl.CostEstimate(
            flops=flops, transcendentals=0, bytes_accessed=bytes_accessed),
    )(inp, w1, w2, w3, b1, b2, b3)


def init_params(key, obs_dim, act_dim, hidden_sizes, num_heads):
    """Deterministic synthetic init (shapes match the module's nn.Linear layers), f32."""
    D = obs_dim + act_dim
    H1, H2 = hidden_sizes
    ks = jax.random.split(key, 6)

    def u(k, shape, fan_in):
        bound = 1.0 / jnp.sqrt(jnp.float32(fan_in))
        return jax.random.uniform(k, shape, jnp.float32, -bound, bound)

    return {
        "w1": u(ks[0], (num_heads, D, H1), D),       # (head, in, out)
        "b1": u(ks[1], (num_heads, 1, H1), D),
        "w2": u(ks[2], (num_heads, H1, H2), H1),     # (head, in, out)
        "b2": u(ks[3], (num_heads, 1, H2), H1),
        "w3": u(ks[4], (num_heads, 1, H2), H2),      # single output row per head
        "b3": u(ks[5], (num_heads, 1, 1), H2),
    }


def _reference_forward(x, a, params):
    """Pure-JAX f32 reference matching the PyTorch forward."""
    inp = jnp.concatenate((x, a), axis=1)
    cols = []
    for i in range(params["w1"].shape[0]):
        h1 = jnp.maximum(inp @ params["w1"][i] + params["b1"][i], 0.0)
        h2 = jnp.maximum(h1 @ params["w2"][i] + params["b2"][i], 0.0)
        q = h2 @ params["w3"][i].T + params["b3"][i]          # (B, 1)
        cols.append(q[:, 0])                                  # squeeze -> (B,)
    return jnp.stack(cols, axis=1)                            # (B, num_heads)


if __name__ == "__main__":
    key = jax.random.PRNGKey(0)
    k_x, k_a, k_p = jax.random.split(key, 3)

    # Small shapes consistent with the module's forward.
    batch = 8
    obs_dim = 12
    act_dim = 4
    hidden_sizes = (64, 64)   # small stand-in for the default (400, 300)
    num_heads = 4

    x = jax.random.normal(k_x, (batch, obs_dim), jnp.float32)
    a = jax.random.normal(k_a, (batch, act_dim), jnp.float32)
    params_f32 = init_params(k_p, obs_dim, act_dim, hidden_sizes, num_heads)
    params = prepare_params(params_f32)             # one-time bf16 cast of big matrices

    out = q_ensemble_forward(x, a, params)
    out = jax.block_until_ready(out)

    ref = _reference_forward(x, a, params_f32)
    assert out.shape == (batch, num_heads), out.shape
    # Weights/activations go through the MXU in bf16 (f32 accumulation), so compare
    # against the f32 reference with a bf16-appropriate tolerance.
    assert jnp.allclose(out, ref, atol=3e-2, rtol=3e-2), "mismatch vs reference"

    print("KERNEL_OK")
</pallas_src>

<mosaic_0001>
module attributes {stable_mosaic.version = 11 : i64} {
  func.func @_qens_kernel(%arg0: i32, %arg1: memref<8x16xbf16, #tpu.memory_space<vmem>>, %arg2: memref<4x16x64xbf16, #tpu.memory_space<vmem>>, %arg3: memref<4x64x64xbf16, #tpu.memory_space<vmem>>, %arg4: memref<4x1x64xbf16, #tpu.memory_space<vmem>>, %arg5: memref<4x1x64xf32, #tpu.memory_space<vmem>>, %arg6: memref<4x1x64xf32, #tpu.memory_space<vmem>>, %arg7: memref<4x1x1xf32, #tpu.memory_space<vmem>>, %arg8: memref<8x4xf32, #tpu.memory_space<vmem>>) attributes {dimension_semantics = [#tpu.dimension_semantics<parallel>], iteration_bounds = array<i64: 1>, scalar_prefetch = 0 : i64, scratch_operands = 0 : i64, tpu.core_type = #tpu.core_type<tc>, window_params = [{transform_indices = @transform_0, window_bounds = array<i64: 8, 16>}, {pipeline_mode = #tpu.pipeline_mode<synchronous>, transform_indices = @transform_1, window_bounds = array<i64: 4, 16, 64>}, {pipeline_mode = #tpu.pipeline_mode<synchronous>, transform_indices = @transform_2, window_bounds = array<i64: 4, 64, 64>}, {pipeline_mode = #tpu.pipeline_mode<synchronous>, transform_indices = @transform_3, window_bounds = array<i64: 4, 1, 64>}, {pipeline_mode = #tpu.pipeline_mode<synchronous>, transform_indices = @transform_4, window_bounds = array<i64: 4, 1, 64>}, {pipeline_mode = #tpu.pipeline_mode<synchronous>, transform_indices = @transform_5, window_bounds = array<i64: 4, 1, 64>}, {pipeline_mode = #tpu.pipeline_mode<synchronous>, transform_indices = @transform_6, window_bounds = array<i64: 4, 1, 1>}, {transform_indices = @transform_7, window_bounds = array<i64: 8, 4>}]} {
    %c0 = arith.constant 0 : index
    %c0_0 = arith.constant 0 : index
    %0 = vector.load %arg1[%c0, %c0_0] : memref<8x16xbf16, #tpu.memory_space<vmem>>, vector<8x16xbf16>
    %c0_1 = arith.constant 0 : index
    %c0_2 = arith.constant 0 : index
    %c0_3 = arith.constant 0 : index
    %1 = vector.load %arg2[%c0_1, %c0_2, %c0_3] : memref<4x16x64xbf16, #tpu.memory_space<vmem>>, vector<1x16x64xbf16>
    %2 = vector.shape_cast %1 : vector<1x16x64xbf16> to vector<16x64xbf16>
    %cst = arith.constant dense<0.000000e+00> : vector<8x64xf32>
    %3 = tpu.matmul %0, %2, %cst {dimension_numbers = #tpu.dot_dimension_numbers<[1], [0], [0], [1], [0, 0, 1, 1], [], []>} : vector<8x16xbf16>, vector<16x64xbf16>, vector<8x64xf32> -> vector<8x64xf32>
    %c0_4 = arith.constant 0 : index
    %c0_5 = arith.constant 0 : index
    %c0_6 = arith.constant 0 : index
    %4 = vector.load %arg5[%c0_4, %c0_5, %c0_6] : memref<4x1x64xf32, #tpu.memory_space<vmem>>, vector<1x1x64xf32>
    %5 = vector.shape_cast %4 : vector<1x1x64xf32> to vector<1x64xf32>
    %6 = vector.broadcast %5 : vector<1x64xf32> to vector<8x64xf32>
    %7 = arith.addf %3, %6 : vector<8x64xf32>
    %cst_7 = arith.constant 0.000000e+00 : f32
    %8 = vector.broadcast %cst_7 : f32 to vector<8x64xf32>
    %9 = arith.maximumf %7, %8 : vector<8x64xf32>
    %10 = arith.truncf %9 : vector<8x64xf32> to vector<8x64xbf16>
    %c0_8 = arith.constant 0 : index
    %c0_9 = arith.constant 0 : index
    %c0_10 = arith.constant 0 : index
    %11 = vector.load %arg3[%c0_8, %c0_9, %c0_10] : memref<4x64x64xbf16, #tpu.memory_space<vmem>>, vector<1x64x64xbf16>
    %12 = vector.shape_cast %11 : vector<1x64x64xbf16> to vector<64x64xbf16>
    %cst_11 = arith.constant dense<0.000000e+00> : vector<8x64xf32>
    %13 = tpu.matmul %10, %12, %cst_11 {dimension_numbers = #tpu.dot_dimension_numbers<[1], [0], [0], [1], [0, 0, 1, 1], [], []>} : vector<8x64xbf16>, vector<64x64xbf16>, vector<8x64xf32> -> vector<8x64xf32>
    %c0_12 = arith.constant 0 : index
    %c0_13 = arith.constant 0 : index
    %c0_14 = arith.constant 0 : index
    %14 = vector.load %arg6[%c0_12, %c0_13, %c0_14] : memref<4x1x64xf32, #tpu.memory_space<vmem>>, vector<1x1x64xf32>
    %15 = vector.shape_cast %14 : vector<1x1x64xf32> to vector<1x64xf32>
    %16 = vector.broadcast %15 : vector<1x64xf32> to vector<8x64xf32>
    %17 = arith.addf %13, %16 : vector<8x64xf32>
    %cst_15 = arith.constant 0.000000e+00 : f32
    %18 = vector.broadcast %cst_15 : f32 to vector<8x64xf32>
    %19 = arith.maximumf %17, %18 : vector<8x64xf32>
    %c0_16 = arith.constant 0 : index
    %c0_17 = arith.constant 0 : index
    %c0_18 = arith.constant 0 : index
    %20 = vector.load %arg4[%c0_16, %c0_17, %c0_18] : memref<4x1x64xbf16, #tpu.memory_space<vmem>>, vector<1x1x64xbf16>
    %21 = vector.shape_cast %20 : vector<1x1x64xbf16> to vector<1x64xbf16>
    %22 = arith.extf %21 : vector<1x64xbf16> to vector<1x64xf32>
    %23 = vector.broadcast %22 : vector<1x64xf32> to vector<8x64xf32>
    %24 = arith.mulf %19, %23 : vector<8x64xf32>
    %cst_19 = arith.constant dense<0.000000e+00> : vector<8xf32>
    %25 = vector.multi_reduction <add>, %24, %cst_19 [1] : vector<8x64xf32> to vector<8xf32>
    %26 = vector.shape_cast %25 : vector<8xf32> to vector<8x1xf32>
    %c0_20 = arith.constant 0 : index
    %c0_21 = arith.constant 0 : index
    %c0_22 = arith.constant 0 : index
    %27 = vector.load %arg7[%c0_20, %c0_21, %c0_22] : memref<4x1x1xf32, #tpu.memory_space<vmem>>, vector<1x1x1xf32>
    %28 = vector.shape_cast %27 : vector<1x1x1xf32> to vector<1x1xf32>
    %29 = vector.broadcast %28 : vector<1x1xf32> to vector<8x1xf32>
    %30 = arith.addf %26, %29 : vector<8x1xf32>
    %c1 = arith.constant 1 : index
    %c0_23 = arith.constant 0 : index
    %c0_24 = arith.constant 0 : index
    %31 = vector.load %arg2[%c1, %c0_23, %c0_24] : memref<4x16x64xbf16, #tpu.memory_space<vmem>>, vector<1x16x64xbf16>
    %32 = vector.shape_cast %31 : vector<1x16x64xbf16> to vector<16x64xbf16>
    %cst_25 = arith.constant dense<0.000000e+00> : vector<8x64xf32>
    %33 = tpu.matmul %0, %32, %cst_25 {dimension_numbers = #tpu.dot_dimension_numbers<[1], [0], [0], [1], [0, 0, 1, 1], [], []>} : vector<8x16xbf16>, vector<16x64xbf16>, vector<8x64xf32> -> vector<8x64xf32>
    %c1_26 = arith.constant 1 : index
    %c0_27 = arith.constant 0 : index
    %c0_28 = arith.constant 0 : index
    %34 = vector.load %arg5[%c1_26, %c0_27, %c0_28] : memref<4x1x64xf32, #tpu.memory_space<vmem>>, vector<1x1x64xf32>
    %35 = vector.shape_cast %34 : vector<1x1x64xf32> to vector<1x64xf32>
    %36 = vector.broadcast %35 : vector<1x64xf32> to vector<8x64xf32>
    %37 = arith.addf %33, %36 : vector<8x64xf32>
    %cst_29 = arith.constant 0.000000e+00 : f32
    %38 = vector.broadcast %cst_29 : f32 to vector<8x64xf32>
    %39 = arith.maximumf %37, %38 : vector<8x64xf32>
    %40 = arith.truncf %39 : vector<8x64xf32> to vector<8x64xbf16>
    %c1_30 = arith.constant 1 : index
    %c0_31 = arith.constant 0 : index
    %c0_32 = arith.constant 0 : index
    %41 = vector.load %arg3[%c1_30, %c0_31, %c0_32] : memref<4x64x64xbf16, #tpu.memory_space<vmem>>, vector<1x64x64xbf16>
    %42 = vector.shape_cast %41 : vector<1x64x64xbf16> to vector<64x64xbf16>
    %cst_33 = arith.constant dense<0.000000e+00> : vector<8x64xf32>
    %43 = tpu.matmul %40, %42, %cst_33 {dimension_numbers = #tpu.dot_dimension_numbers<[1], [0], [0], [1], [0, 0, 1, 1], [], []>} : vector<8x64xbf16>, vector<64x64xbf16>, vector<8x64xf32> -> vector<8x64xf32>
    %c1_34 = arith.constant 1 : index
    %c0_35 = arith.constant 0 : index
    %c0_36 = arith.constant 0 : index
    %44 = vector.load %arg6[%c1_34, %c0_35, %c0_36] : memref<4x1x64xf32, #tpu.memory_space<vmem>>, vector<1x1x64xf32>
    %45 = vector.shape_cast %44 : vector<1x1x64xf32> to vector<1x64xf32>
    %46 = vector.broadcast %45 : vector<1x64xf32> to vector<8x64xf32>
    %47 = arith.addf %43, %46 : vector<8x64xf32>
    %cst_37 = arith.constant 0.000000e+00 : f32
    %48 = vector.broadcast %cst_37 : f32 to vector<8x64xf32>
    %49 = arith.maximumf %47, %48 : vector<8x64xf32>
    %c1_38 = arith.constant 1 : index
    %c0_39 = arith.constant 0 : index
    %c0_40 = arith.constant 0 : index
    %50 = vector.load %arg4[%c1_38, %c0_39, %c0_40] : memref<4x1x64xbf16, #tpu.memory_space<vmem>>, vector<1x1x64xbf16>
    %51 = vector.shape_cast %50 : vector<1x1x64xbf16> to vector<1x64xbf16>
    %52 = arith.extf %51 : vector<1x64xbf16> to vector<1x64xf32>
    %53 = vector.broadcast %52 : vector<1x64xf32> to vector<8x64xf32>
    %54 = arith.mulf %49, %53 : vector<8x64xf32>
    %cst_41 = arith.constant dense<0.000000e+00> : vector<8xf32>
    %55 = vector.multi_reduction <add>, %54, %cst_41 [1] : vector<8x64xf32> to vector<8xf32>
    %56 = vector.shape_cast %55 : vector<8xf32> to vector<8x1xf32>
    %c1_42 = arith.constant 1 : index
    %c0_43 = arith.constant 0 : index
    %c0_44 = arith.constant 0 : index
    %57 = vector.load %arg7[%c1_42, %c0_43, %c0_44] : memref<4x1x1xf32, #tpu.memory_space<vmem>>, vector<1x1x1xf32>
    %58 = vector.shape_cast %57 : vector<1x1x1xf32> to vector<1x1xf32>
    %59 = vector.broadcast %58 : vector<1x1xf32> to vector<8x1xf32>
    %60 = arith.addf %56, %59 : vector<8x1xf32>
    %c2 = arith.constant 2 : index
    %c0_45 = arith.constant 0 : index
    %c0_46 = arith.constant 0 : index
    %61 = vector.load %arg2[%c2, %c0_45, %c0_46] : memref<4x16x64xbf16, #tpu.memory_space<vmem>>, vector<1x16x64xbf16>
    %62 = vector.shape_cast %61 : vector<1x16x64xbf16> to vector<16x64xbf16>
    %cst_47 = arith.constant dense<0.000000e+00> : vector<8x64xf32>
    %63 = tpu.matmul %0, %62, %cst_47 {dimension_numbers = #tpu.dot_dimension_numbers<[1], [0], [0], [1], [0, 0, 1, 1], [], []>} : vector<8x16xbf16>, vector<16x64xbf16>, vector<8x64xf32> -> vector<8x64xf32>
    %c2_48 = arith.constant 2 : index
    %c0_49 = arith.constant 0 : index
    %c0_50 = arith.constant 0 : index
    %64 = vector.load %arg5[%c2_48, %c0_49, %c0_50] : memref<4x1x64xf32, #tpu.memory_space<vmem>>, vector<1x1x64xf32>
    %65 = vector.shape_cast %64 : vector<1x1x64xf32> to vector<1x64xf32>
    %66 = vector.broadcast %65 : vector<1x64xf32> to vector<8x64xf32>
    %67 = arith.addf %63, %66 : vector<8x64xf32>
    %cst_51 = arith.constant 0.000000e+00 : f32
    %68 = vector.broadcast %cst_51 : f32 to vector<8x64xf32>
    %69 = arith.maximumf %67, %68 : vector<8x64xf32>
    %70 = arith.truncf %69 : vector<8x64xf32> to vector<8x64xbf16>
    %c2_52 = arith.constant 2 : index
    %c0_53 = arith.constant 0 : index
    %c0_54 = arith.constant 0 : index
    %71 = vector.load %arg3[%c2_52, %c0_53, %c0_54] : memref<4x64x64xbf16, #tpu.memory_space<vmem>>, vector<1x64x64xbf16>
    %72 = vector.shape_cast %71 : vector<1x64x64xbf16> to vector<64x64xbf16>
    %cst_55 = arith.constant dense<0.000000e+00> : vector<8x64xf32>
    %73 = tpu.matmul %70, %72, %cst_55 {dimension_numbers = #tpu.dot_dimension_numbers<[1], [0], [0], [1], [0, 0, 1, 1], [], []>} : vector<8x64xbf16>, vector<64x64xbf16>, vector<8x64xf32> -> vector<8x64xf32>
    %c2_56 = arith.constant 2 : index
    %c0_57 = arith.constant 0 : index
    %c0_58 = arith.constant 0 : index
    %74 = vector.load %arg6[%c2_56, %c0_57, %c0_58] : memref<4x1x64xf32, #tpu.memory_space<vmem>>, vector<1x1x64xf32>
    %75 = vector.shape_cast %74 : vector<1x1x64xf32> to vector<1x64xf32>
    %76 = vector.broadcast %75 : vector<1x64xf32> to vector<8x64xf32>
    %77 = arith.addf %73, %76 : vector<8x64xf32>
    %cst_59 = arith.constant 0.000000e+00 : f32
    %78 = vector.broadcast %cst_59 : f32 to vector<8x64xf32>
    %79 = arith.maximumf %77, %78 : vector<8x64xf32>
    %c2_60 = arith.constant 2 : index
    %c0_61 = arith.constant 0 : index
    %c0_62 = arith.constant 0 : index
    %80 = vector.load %arg4[%c2_60, %c0_61, %c0_62] : memref<4x1x64xbf16, #tpu.memory_space<vmem>>, vector<1x1x64xbf16>
    %81 = vector.shape_cast %80 : vector<1x1x64xbf16> to vector<1x64xbf16>
    %82 = arith.extf %81 : vector<1x64xbf16> to vector<1x64xf32>
    %83 = vector.broadcast %82 : vector<1x64xf32> to vector<8x64xf32>
    %84 = arith.mulf %79, %83 : vector<8x64xf32>
    %cst_63 = arith.constant dense<0.000000e+00> : vector<8xf32>
    %85 = vector.multi_reduction <add>, %84, %cst_63 [1] : vector<8x64xf32> to vector<8xf32>
    %86 = vector.shape_cast %85 : vector<8xf32> to vector<8x1xf32>
    %c2_64 = arith.constant 2 : index
    %c0_65 = arith.constant 0 : index
    %c0_66 = arith.constant 0 : index
    %87 = vector.load %arg7[%c2_64, %c0_65, %c0_66] : memref<4x1x1xf32, #tpu.memory_space<vmem>>, vector<1x1x1xf32>
    %88 = vector.shape_cast %87 : vector<1x1x1xf32> to vector<1x1xf32>
    %89 = vector.broadcast %88 : vector<1x1xf32> to vector<8x1xf32>
    %90 = arith.addf %86, %89 : vector<8x1xf32>
    %c3 = arith.constant 3 : index
    %c0_67 = arith.constant 0 : index
    %c0_68 = arith.constant 0 : index
    %91 = vector.load %arg2[%c3, %c0_67, %c0_68] : memref<4x16x64xbf16, #tpu.memory_space<vmem>>, vector<1x16x64xbf16>
    %92 = vector.shape_cast %91 : vector<1x16x64xbf16> to vector<16x64xbf16>
    %cst_69 = arith.constant dense<0.000000e+00> : vector<8x64xf32>
    %93 = tpu.matmul %0, %92, %cst_69 {dimension_numbers = #tpu.dot_dimension_numbers<[1], [0], [0], [1], [0, 0, 1, 1], [], []>} : vector<8x16xbf16>, vector<16x64xbf16>, vector<8x64xf32> -> vector<8x64xf32>
    %c3_70 = arith.constant 3 : index
    %c0_71 = arith.constant 0 : index
    %c0_72 = arith.constant 0 : index
    %94 = vector.load %arg5[%c3_70, %c0_71, %c0_72] : memref<4x1x64xf32, #tpu.memory_space<vmem>>, vector<1x1x64xf32>
    %95 = vector.shape_cast %94 : vector<1x1x64xf32> to vector<1x64xf32>
    %96 = vector.broadcast %95 : vector<1x64xf32> to vector<8x64xf32>
    %97 = arith.addf %93, %96 : vector<8x64xf32>
    %cst_73 = arith.constant 0.000000e+00 : f32
    %98 = vector.broadcast %cst_73 : f32 to vector<8x64xf32>
    %99 = arith.maximumf %97, %98 : vector<8x64xf32>
    %100 = arith.truncf %99 : vector<8x64xf32> to vector<8x64xbf16>
    %c3_74 = arith.constant 3 : index
    %c0_75 = arith.constant 0 : index
    %c0_76 = arith.constant 0 : index
    %101 = vector.load %arg3[%c3_74, %c0_75, %c0_76] : memref<4x64x64xbf16, #tpu.memory_space<vmem>>, vector<1x64x64xbf16>
    %102 = vector.shape_cast %101 : vector<1x64x64xbf16> to vector<64x64xbf16>
    %cst_77 = arith.constant dense<0.000000e+00> : vector<8x64xf32>
    %103 = tpu.matmul %100, %102, %cst_77 {dimension_numbers = #tpu.dot_dimension_numbers<[1], [0], [0], [1], [0, 0, 1, 1], [], []>} : vector<8x64xbf16>, vector<64x64xbf16>, vector<8x64xf32> -> vector<8x64xf32>
    %c3_78 = arith.constant 3 : index
    %c0_79 = arith.constant 0 : index
    %c0_80 = arith.constant 0 : index
    %104 = vector.load %arg6[%c3_78, %c0_79, %c0_80] : memref<4x1x64xf32, #tpu.memory_space<vmem>>, vector<1x1x64xf32>
    %105 = vector.shape_cast %104 : vector<1x1x64xf32> to vector<1x64xf32>
    %106 = vector.broadcast %105 : vector<1x64xf32> to vector<8x64xf32>
    %107 = arith.addf %103, %106 : vector<8x64xf32>
    %cst_81 = arith.constant 0.000000e+00 : f32
    %108 = vector.broadcast %cst_81 : f32 to vector<8x64xf32>
    %109 = arith.maximumf %107, %108 : vector<8x64xf32>
    %c3_82 = arith.constant 3 : index
    %c0_83 = arith.constant 0 : index
    %c0_84 = arith.constant 0 : index
    %110 = vector.load %arg4[%c3_82, %c0_83, %c0_84] : memref<4x1x64xbf16, #tpu.memory_space<vmem>>, vector<1x1x64xbf16>
    %111 = vector.shape_cast %110 : vector<1x1x64xbf16> to vector<1x64xbf16>
    %112 = arith.extf %111 : vector<1x64xbf16> to vector<1x64xf32>
    %113 = vector.broadcast %112 : vector<1x64xf32> to vector<8x64xf32>
    %114 = arith.mulf %109, %113 : vector<8x64xf32>
    %cst_85 = arith.constant dense<0.000000e+00> : vector<8xf32>
    %115 = vector.multi_reduction <add>, %114, %cst_85 [1] : vector<8x64xf32> to vector<8xf32>
    %116 = vector.shape_cast %115 : vector<8xf32> to vector<8x1xf32>
    %c3_86 = arith.constant 3 : index
    %c0_87 = arith.constant 0 : index
    %c0_88 = arith.constant 0 : index
    %117 = vector.load %arg7[%c3_86, %c0_87, %c0_88] : memref<4x1x1xf32, #tpu.memory_space<vmem>>, vector<1x1x1xf32>
    %118 = vector.shape_cast %117 : vector<1x1x1xf32> to vector<1x1xf32>
    %119 = vector.broadcast %118 : vector<1x1xf32> to vector<8x1xf32>
    %120 = arith.addf %116, %119 : vector<8x1xf32>
    %121 = tpu.concatenate %30, %60, %90, %120 in 1 : vector<8x1xf32>, vector<8x1xf32>, vector<8x1xf32>, vector<8x1xf32> -> vector<8x4xf32>
    %c0_89 = arith.constant 0 : index
    %c0_90 = arith.constant 0 : index
    %122 = vector.load %arg8[%c0_89, %c0_90] : memref<8x4xf32, #tpu.memory_space<vmem>>, vector<8x4xf32>
    tpu.vector_store %arg8[%c0_89, %c0_90], %121 {strides = array<i32>} : memref<8x4xf32, #tpu.memory_space<vmem>>, vector<8x4xf32>,
    return
  }
  func.func @transform_0(%arg0: i32) -> (i32, i32) {
    %c0_i32 = arith.constant 0 : i32
    %c0_i32_0 = arith.constant 0 : i32
    return %arg0, %c0_i32 : i32, i32
  }
  func.func @transform_1(%arg0: i32) -> (i32, i32, i32) {
    %c0_i32 = arith.constant 0 : i32
    %c0_i32_0 = arith.constant 0 : i32
    %c0_i32_1 = arith.constant 0 : i32
    %c0_i32_2 = arith.constant 0 : i32
    return %c0_i32, %c0_i32_0, %c0_i32_1 : i32, i32, i32
  }
  func.func @transform_2(%arg0: i32) -> (i32, i32, i32) {
    %c0_i32 = arith.constant 0 : i32
    %c0_i32_0 = arith.constant 0 : i32
    %c0_i32_1 = arith.constant 0 : i32
    %c0_i32_2 = arith.constant 0 : i32
    return %c0_i32, %c0_i32_0, %c0_i32_1 : i32, i32, i32
  }
  func.func @transform_3(%arg0: i32) -> (i32, i32, i32) {
    %c0_i32 = arith.constant 0 : i32
    %c0_i32_0 = arith.constant 0 : i32
    %c0_i32_1 = arith.constant 0 : i32
    %c0_i32_2 = arith.constant 0 : i32
    return %c0_i32, %c0_i32_0, %c0_i32_1 : i32, i32, i32
  }
  func.func @transform_4(%arg0: i32) -> (i32, i32, i32) {
    %c0_i32 = arith.constant 0 : i32
    %c0_i32_0 = arith.constant 0 : i32
    %c0_i32_1 = arith.constant 0 : i32
    %c0_i32_2 = arith.constant 0 : i32
    return %c0_i32, %c0_i32_0, %c0_i32_1 : i32, i32, i32
  }
  func.func @transform_5(%arg0: i32) -> (i32, i32, i32) {
    %c0_i32 = arith.constant 0 : i32
    %c0_i32_0 = arith.constant 0 : i32
    %c0_i32_1 = arith.constant 0 : i32
    %c0_i32_2 = arith.constant 0 : i32
    return %c0_i32, %c0_i32_0, %c0_i32_1 : i32, i32, i32
  }
  func.func @transform_6(%arg0: i32) -> (i32, i32, i32) {
    %c0_i32 = arith.constant 0 : i32
    %c0_i32_0 = arith.constant 0 : i32
    %c0_i32_1 = arith.constant 0 : i32
    %c0_i32_2 = arith.constant 0 : i32
    return %c0_i32, %c0_i32_0, %c0_i32_1 : i32, i32, i32
  }
  func.func @transform_7(%arg0: i32) -> (i32, i32) {
    %c0_i32 = arith.constant 0 : i32
    %c0_i32_0 = arith.constant 0 : i32
    return %arg0, %c0_i32 : i32, i32
  }
}

</mosaic_0001>

<bundles_post_ra>
// kernel: q_ensemble_forward.1
= control target key start
LH: loop header
LB: loop body
LE: loop exit
PB: predicated region body
PF: predicated region fallthrough
CT: control target
= control target key end

     0   :  { %12 = vsyncpa [#allocation3], 0  ;;  %s630_s27 = smov [#allocation2]   ;;  %s631_s29 = smov 64   ;;  %s757_s0 = inlined_call_operand.vmem [shape: bf16[8,16], index: 0, kind: input, shape index: {}]   ;;  %s758_s1 = inlined_call_operand.vmem [shape: bf16[4,16,64], index: 1, kind: input, shape index: {}]   ;;  %s759_s2 = inlined_call_operand.hbm [shape: bf16[4,64,64], index: 2, kind: input, shape index: {}]   ;;  %s760_s3 = inlined_call_operand.vmem [shape: bf16[4,1,64], index: 3, kind: input, shape index: {}]   ;;  %s761_s4 = inlined_call_operand.vmem [shape: f32[4,1,64], index: 4, kind: input, shape index: {}]   ;;  %s762_s5 = inlined_call_operand.vmem [shape: f32[4,1,64], index: 5, kind: input, shape index: {}]   ;;  %s763_s6 = inlined_call_operand.vmem [shape: f32[4,1,1], index: 6, kind: input, shape index: {}]   ;;  %s764_s7 = inlined_call_operand.vmem [shape: f32[8,4], index: 7, kind: output, shape index: {}]  }
   0x1   :  { %s21_s26 = sshll.u32 %s759_s2, 4  ;;  %s23_s28 = sshll.u32 %s630_s27, 4  ;;  %s22_s26 = int_to_ptr.hbm [resolvable:$true] %s21_s26  ;;  %s24_s28 = int_to_ptr.vmem [resolvable:$true] %s23_s28 }
   0x2   :  { %s632_s30 = smov 4  }
   0x3   :  { %29 = dma.hbm_to_vmem [thread:$0]  %s22_s26, 2048, %s24_s28, [#allocation3], %s631_s29, %s631_s29, %s632_s30  }
   0x4   :  { %628 = dma.done.wait [#allocation3], 2048  }
   0x5   :  { %629 = vsyncadd [#allocation3], 4294965248  ;;  %v566_v0 = vld [vmem:[%s758_s1] sm:$0xff]  ;;  %v571_v1 = vld [vmem:[%s758_s1 + $0x8] sm:$0xff]  ;;  %vm56_vm0 = vcmask 130048   ;;  %vm111_vm1 = vcmask 523264  }
   0x6   :  { %v43_v2 = vld [vmem:[%s757_s0] sm:$0xf]  ;;  %v576_v3 = vld [vmem:[%s758_s1 + $0x10] sm:$0xff]  ;;  %v570_v4 = vld [vmem:[#allocation2 + $0x18] sm:$0xff]  ;;  %67 = vmatpush.bf16.msra.mxu0 %v566_v0  ;;  %162 = vmatpush.bf16.msra.mxu2 %v571_v1  ;;  %s633_s9 = smov 1   ;;  %s634_s2 = smov 2  }
   0x7   :  { %v569_v5 = vld [vmem:[#allocation2 + $0x10] sm:$0xff]  ;;  %119 = vmatpush.bf16.msra.mxu1 %v570_v4  ;;  %v568_v6 = vld [vmem:[#allocation2 + $0x8] sm:$0xff]  ;;  %v567_v7 = vld [vmem:[#allocation2] sm:$0xff]  ;;  %vm447_vm2 = vcmask 7168   ;;  %vm449_vm3 = vcmask 15360   ;;  %vm451_vm4 = vcmask 23552  }
   0x8   :  { %v581_v8 = vld [vmem:[%s758_s1 + $0x18] sm:$0xff]  ;;  %v574_v11 = vld [vmem:[#allocation2 + $0x30] sm:$0xff]  ;;  %v592_v13 = vld [vmem:[%s761_s4] ss:$0 sm:$0xff]  ;;  %vm453_vm5 = vcmask 31744  }
   0x9   :  { %464 = vmatmul.msk.bf16.vlgmr.msra.gmra.mxu0 %vm56_vm0, %v43_v2  ;;  %489 = vmatmul.msk.bf16.vlgmr.msra.gmra.mxu2 %vm56_vm0, %v43_v2  ;;  %v575_v9 = vld [vmem:[#allocation2 + $0x38] sm:$0xff]  ;;  %v579_v12 = vld [vmem:[#allocation2 + $0x50] sm:$0xff]  ;;  %v573_v14 = vld [vmem:[#allocation2 + $0x28] sm:$0xff] }
   0xa   :  { %260 = vmatpush.bf16.msrb.mxu0 %v576_v3  ;;  %v580_v10 = vld [vmem:[#allocation2 + $0x58] sm:$0xff]  ;;  %215 = vmatpush.bf16.msra.mxu3 %v575_v9  ;;  %v578_v15 = vld [vmem:[#allocation2 + $0x48] sm:$0xff]  ;;  %v572_v18 = vld [vmem:[#allocation2 + $0x20] sm:$0xff] }
   0xb   :  { %120 = vmatpush.bf16.msra.mxu1 %v569_v5  ;;  %313 = vmatpush.bf16.msrb.mxu2 %v580_v10  ;;  %v577_v19 = vld [vmem:[#allocation2 + $0x40] sm:$0xff]  ;;  %v585_v35 = vld [vmem:[#allocation2 + $0x78] sm:$0xff]  ;;  %v584_v36 = vld [vmem:[#allocation2 + $0x70] sm:$0xff] }
   0xc   :  { %v593_v21 = vld [vmem:[%s761_s4 + $0x1] ss:$0 sm:$0xff]  ;;  %v594_v28 = vld [vmem:[%s761_s4 + $0x2] ss:$0 sm:$0xff]  ;;  %v583_v37 = vld [vmem:[#allocation2 + $0x68] sm:$0xff] }
   0xd   :  { %v582_v38 = vld [vmem:[#allocation2 + $0x60] sm:$0xff] }
   0xe   :  { %216 = vmatpush.bf16.msra.mxu3 %v574_v11  ;;  %v508_v40 = vld [vmem:[%s760_s3 + $0x1] sm:$0x1]  ;;  %v596_v45 = vld [vmem:[%s761_s4 + $0x3] ss:$0 sm:$0xff]  ;;  %v536_v50 = vld [vmem:[%s760_s3 + $0x2] sm:$0x1] }
   0xf   :  { %121 = vmatpush.bf16.msra.mxu1 %v568_v6  ;;  %314 = vmatpush.bf16.msrb.mxu2 %v579_v12  ;;  %v597_v42 = vld [vmem:[%s762_s5 + $0x1] ss:$0 sm:$0xff]  ;;  %v227_v43 = vunpack.c.l.bf16 %v508_v40  ;;  %v598_v55 = vld [vmem:[%s762_s5 + $0x2] ss:$0 sm:$0xff]  ;;  %v325_v56 = vunpack.c.l.bf16 %v536_v50  ;;  %v564_v9 = vld [vmem:[%s760_s3 + $0x3] sm:$0x1] }
  0x10   :  { %v600_v3 = vld [vmem:[%s763_s6 + $0x1] ss:$0 sm:$0xff]  ;;  %v601_v6 = vld [vmem:[%s763_s6 + $0x2] ss:$0 sm:$0xff]  ;;  %v599_v10 = vld [vmem:[%s762_s5 + $0x3] ss:$0 sm:$0xff]  ;;  %v423_v11 = vunpack.c.l.bf16 %v564_v9 }
  0x11   :  { %v228_v47 = vperm.slane %v227_v43, 0  ;;  %v326_v61 = vperm.slane %v325_v56, 0  ;;  %v595_v12 = vld [vmem:[%s762_s5] ss:$0 sm:$0xff] }
  0x12   :  { %217 = vmatpush.bf16.msra.mxu3 %v573_v14  ;;  %v129_v14 = vld [vmem:[%s760_s3] sm:$0x1]  ;;  %s635_s3 = smov 3  }
  0x13   :  { %122 = vmatpush.bf16.msra.mxu1 %v567_v7  ;;  %315 = vmatpush.bf16.msrb.mxu2 %v578_v15 }
  0x16   :  { %218 = vmatpush.bf16.msra.mxu3 %v572_v18 }
  0x17   :  { %358 = vmatpush.bf16.msrb.mxu1 %v581_v8  ;;  %316 = vmatpush.bf16.msrb.mxu2 %v577_v19  ;;  %v130_v19 = vunpack.c.l.bf16 %v129_v14 }
  0x19   :  { %517 = vmatmul.msk.bf16.vlgmr.msrb.gmra.mxu0 %vm56_vm0, %v43_v2 }
  0x1a   :  { %411 = vmatpush.bf16.msrb.mxu3 %v585_v35 }
  0x1e   :  { %412 = vmatpush.bf16.msrb.mxu3 %v584_v36 }
  0x22   :  { %413 = vmatpush.bf16.msrb.mxu3 %v583_v37 }
  0x26   :  { %414 = vmatpush.bf16.msrb.mxu3 %v582_v38 }
  0x86   :  { %v69_v16 = vpop.f32.mrf.mxu0 }
  0x87   :  { %v70_v17 = vadd.f32 %v592_v13, %v69_v16  ;;  %v424_v16 = vperm.slane %v423_v11, 0 }
  0x89   :  { %v73_v20 = vmax.f32 %v70_v17, 0.0 }
  0x8b   :  { %v74_v22 = vpack.c.bf16 %v73_v20, %v73_v20 }
  0x8c   :  { %v164_v23 = vpop.f32.mrf.mxu2 }
  0x8d   :  { %481 = vmatmul.msk.bf16.vlgmr.msra.gmra.mxu1 %vm111_vm1, %v74_v22  ;;  %v165_v24 = vadd.f32 %v593_v21, %v164_v23  ;;  %v131_v23 = vperm.slane %v130_v19, 0 }
  0x8e   :  { %v71_v25 = vpop.f32.mrf.mxu0 }
  0x8f   :  { %v168_v26 = vmax.f32 %v165_v24, 0.0 }
  0x91   :  { %v169_v27 = vpack.c.bf16 %v168_v26, %v168_v26 }
  0x93   :  { %507 = vmatmul.msk.bf16.vlgmr.msra.gmra.mxu3 %vm111_vm1, %v169_v27  ;;  %v602_v27 = vld [vmem:[%s763_s6 + $0x3] ss:$0 sm:$0xff] }
  0x94   :  { %v166_v29 = vpop.f32.mrf.mxu2 }
  0x96   :  { %v262_v30 = vpop.f32.mrf.mxu0 }
  0x97   :  { %v263_v31 = vadd.f32 %v594_v28, %v262_v30 }
  0x99   :  { %v266_v32 = vmax.f32 %v263_v31, 0.0  ;;  %v603_v31 = vld [vmem:[%s763_s6] ss:$0 sm:$0xff] }
  0x9b   :  { %v267_v33 = vpack.c.bf16 %v266_v32, %v266_v32 }
  0x9d   :  { %545 = vmatmul.msk.bf16.vlgmr.msrb.gmra.mxu1 %vm56_vm0, %v43_v2  ;;  %535 = vmatmul.msk.bf16.vlgmr.msrb.gmra.mxu2 %vm111_vm1, %v267_v33 }
  0x9e   :  { %v264_v34 = vpop.f32.mrf.mxu0 }
 0x10a   :  { %v124_v39 = vpop.f32.mrf.mxu1 }
 0x10b   :  { %v125_v17 = vadd.f32 %v595_v12, %v124_v39 }
 0x10d   :  { %v128_v21 = vmax.f32 %v125_v17, 0.0 }
 0x10f   :  { %v132_v25 = vmul.f32 %v131_v23, %v128_v21 }
 0x111   :  { %v133_v26 = vsel %vm111_vm1, %v132_v25, 0.0 }
 0x112   :  { %v126_v41 = vpop.f32.mrf.mxu1 }
 0x116   :  { %v220_v44 = vpop.f32.mrf.mxu3 }
 0x117   :  { %v221_v46 = vadd.f32 %v597_v42, %v220_v44 }
 0x119   :  { %v224_v48 = vmax.f32 %v221_v46, 0.0 }
 0x11a   :  { %v360_v49 = vpop.f32.mrf.mxu1 }
 0x11b   :  { %v361_v51 = vadd.f32 %v596_v45, %v360_v49  ;;  %v229_v52 = vmul.f32 %v228_v47, %v224_v48 }
 0x11d   :  { %v364_v53 = vmax.f32 %v361_v51, 0.0  ;;  %v230_v54 = vsel %vm111_vm1, %v229_v52, 0.0 }
 0x11e   :  { %231 = vadd.xlane.f32.xlu0 %v230_v54  ;;  %v222_v57 = vpop.f32.mrf.mxu3 }
 0x11f   :  { %v365_v58 = vpack.c.bf16 %v364_v53, %v364_v53 }
 0x120   :  { %v318_v59 = vpop.f32.mrf.mxu2 }
 0x121   :  { %563 = vmatmul.msk.bf16.vlgmr.msrb.gmra.mxu3 %vm111_vm1, %v365_v58  ;;  %v319_v60 = vadd.f32 %v598_v55, %v318_v59 }
 0x122   :  { %v362_v62 = vpop.f32.mrf.mxu1 }
 0x123   :  { %v322_v63 = vmax.f32 %v319_v60, 0.0 }
 0x125   :  { %v327_v0 = vmul.f32 %v326_v61, %v322_v63 }
 0x127   :  { %v328_v1 = vsel %vm111_vm1, %v327_v0, 0.0 }
 0x128   :  { %329 = vadd.xlane.f32.xlu0 %v328_v1  ;;  %v320_v2 = vpop.f32.mrf.mxu2 }
 0x191   :  { %v232_v4 = vpop.xlane.xlu0 %231 }
 0x192   :  { %v238_v5 = vadd.f32 %v600_v3, %v232_v4 }
 0x194   :  { %436 = vrot.lane.b32.xlu2 %v238_v5, %s633_s9 }
 0x19b   :  { %v330_v7 = vpop.xlane.xlu0 %329 }
 0x19c   :  { %v336_v8 = vadd.f32 %v601_v6, %v330_v7 }
 0x19e   :  { %440 = vrot.lane.b32.xlu2 %v336_v8, %s634_s2 }
 0x1a4   :  { %v416_v13 = vpop.f32.mrf.mxu3 }
 0x1a5   :  { %v417_v15 = vadd.f32 %v599_v10, %v416_v13 }
 0x1a7   :  { %v420_v18 = vmax.f32 %v417_v15, 0.0 }
 0x1a9   :  { %v425_v20 = vmul.f32 %v424_v16, %v420_v18 }
 0x1ab   :  { %v426_v22 = vsel %vm111_vm1, %v425_v20, 0.0 }
 0x1ac   :  { %v418_v24 = vpop.f32.mrf.mxu3  ;;  %427 = vadd.xlane.f32.xlu1 %v426_v22 }
 0x1b4   :  { %134 = vadd.xlane.f32.xlu1 %v133_v26 }
 0x1ee   :  { %v437_v30 = vpop.permute.xlu2 %436 }
 0x1f8   :  { %v441_v34 = vpop.permute.xlu2 %440 }
 0x21f   :  { %v428_v28 = vpop.xlane.xlu1 %427 }
 0x220   :  { %v434_v29 = vadd.f32 %v602_v27, %v428_v28 }
 0x222   :  { %444 = vrot.lane.b32.xlu0 %v434_v29, %s635_s3 }
 0x227   :  { %v135_v32 = vpop.xlane.xlu1 %134 }
 0x228   :  { %v140_v33 = vadd.f32 %v603_v31, %v135_v32 }
 0x22a   :  { %v448_v35 = vsel %vm447_vm2, %v140_v33, %v437_v30 }
 0x22b   :  { %v450_v36 = vsel %vm449_vm3, %v448_v35, %v441_v34 }
 0x294   :  { %v445_v37 = vpop.permute.xlu0 %444 }
 0x295   :  { %v452_v38 = vsel %vm451_vm4, %v450_v36, %v445_v37 }
 0x296   :  { %454 = vst.msk [vmem:[%s764_s7] sm:$0xff] %vm453_vm5, %v452_v38 }
 0x297   :  { %459 = vsyncpa [#allocation3], 1 }

</bundles_post_ra>
